<compile_context>
chip_gen: v7x
topology: tpu7x:2x2x1
jax: 0.10.0
libtpu: 0.0.40
codegen_flags: <defaults>
</compile_context>

<pallas_src>
import functools
import math

import jax
import jax.numpy as jnp
from jax.experimental import pallas as pl
from jax.experimental.pallas import tpu as pltpu


def _srl(x, k):
    """Logical right shift for int32 (arithmetic shift + mask)."""
    return jnp.bitwise_and(jnp.right_shift(x, k), jnp.int32((1 << (32 - k)) - 1))


def _mix32(x):
    """lowbias32-style integer mixer; int32 multiply wraps (two's complement)."""
    x = jnp.bitwise_xor(x, _srl(x, 16))
    x = x * jnp.int32(0x7FEB352D)
    x = jnp.bitwise_xor(x, _srl(x, 15))
    x = x * jnp.int32(0x846CA68B - (1 << 32))   # 0x846CA68B as signed int32
    x = jnp.bitwise_xor(x, _srl(x, 16))
    return x


def _pe_dropout_kernel(seed_ref, x_ref, pe_ref, o_ref, *,
                       dropout_rate, training, rows_total, lanes):
    # Blocks are (1, TR, L). The pe block is invariant over the batch grid axis, so with
    # batch innermost it is only DMA'd once per row tile.
    y = x_ref[...].astype(jnp.float32) + pe_ref[...].astype(jnp.float32)

    if training and dropout_rate > 0.0:
        blk = x_ref.shape                                   # (1, TR, L), static
        rt = pl.program_id(0)                               # row-tile index
        b = pl.program_id(1)                                # batch index
        r = jax.lax.broadcasted_iota(jnp.int32, blk, 1)
        c = jax.lax.broadcasted_iota(jnp.int32, blk, 2)
        row = rt * blk[1] + r                               # global row in folded view
        linear = (b * rows_total + row) * lanes + c         # unique per element
        bits = _mix32(jnp.bitwise_xor(linear, _mix32(seed_ref[0])))
        bits24 = jnp.bitwise_and(bits, jnp.int32(0x00FFFFFF))
        # Integer-domain keep test: keep with prob (1 - p); p quantised to 1/2^24.
        thresh = jnp.int32(int(round(dropout_rate * (1 << 24))))
        scale = jnp.float32(1.0 / (1.0 - dropout_rate))
        y = jnp.where(bits24 >= thresh, y * scale, jnp.float32(0.0))

    o_ref[...] = y.astype(o_ref.dtype)


def make_positional_encoding(d_model: int, seq_len: int) -> jnp.ndarray:
    """Build the (1, seq_len, d_model) PE buffer exactly as the PyTorch __init__ does."""
    position = jnp.arange(seq_len, dtype=jnp.float32)[:, None]            # (S, 1)
    # NOTE: reproducing the reference verbatim (no negative sign in the exponent).
    div_term = jnp.exp(
        jnp.arange(0, d_model, 2, dtype=jnp.float32) * (math.log(10000.0) / d_model)
    )                                                                     # (D/2,)
    pe = jnp.zeros((seq_len, d_model), dtype=jnp.float32)
    pe = pe.at[:, 0::2].set(jnp.sin(position * div_term))
    pe = pe.at[:, 1::2].set(jnp.cos(position * div_term))
    return pe[None, :, :]                                                 # (1, S, D)


def _choose_row_tile(num_rows, lanes, itemsize, target_bytes=2 * 1024 * 1024):
    """Rows per block: ~2 MiB per (rows, lanes) tile, multiple of 8, or the full dim.

    2 MiB blocks keep x/pe/out double buffers at ~12 MiB total, inside the default
    scoped VMEM limits (16 MiB v5e, 32 MiB v6e/v7x) with headroom on v7x's 64 MiB.
    """
    rows = max(8, target_bytes // max(1, lanes * itemsize))
    if rows >= num_rows:
        return num_rows
    return max(8, (rows // 8) * 8)


def positional_encoding_forward(x, pe, *, dropout_rate=0.1, training=False, seed=0):
    """x: (B, S, D); pe: (1, seq_len_max, D) from make_positional_encoding."""
    B, S, D = x.shape
    pe_slice = pe[:, :S, :].astype(x.dtype)   # streamed bytes match activation dtype

    # Fold (S, D) into lane-dense (rows, 128) whenever possible -> unmasked full-lane
    # stores even for small d_model.
    if (S * D) % 128 == 0:
        L = 128
        R = (S * D) // 128
    else:
        L = D
        R = S
    x2 = x.reshape(B, R, L)
    pe2 = pe_slice.reshape(1, R, L)

    TR = _choose_row_tile(R, L, x.dtype.itemsize)
    grid = (pl.cdiv(R, TR), B)   # batch innermost: pe block fetched once per row tile

    kernel = functools.partial(
        _pe_dropout_kernel,
        dropout_rate=float(dropout_rate),
        training=bool(training),
        rows_total=R,
        lanes=L,
    )
    seed_arr = jnp.asarray([seed], dtype=jnp.int32)

    grid_spec = pltpu.PrefetchScalarGridSpec(
        num_scalar_prefetch=1,
        grid=grid,
        in_specs=[
            pl.BlockSpec((1, TR, L), lambda t, b, seed: (b, t, 0)),   # x
            pl.BlockSpec((1, TR, L), lambda t, b, seed: (0, t, 0)),   # pe (batch-invariant)
        ],
        out_specs=pl.BlockSpec((1, TR, L), lambda t, b, seed: (b, t, 0)),
    )

    out2 = pl.pallas_call(
        kernel,
        out_shape=jax.ShapeDtypeStruct((B, R, L), x.dtype),
        grid_spec=grid_spec,
        compiler_params=pltpu.CompilerParams(
            dimension_semantics=("parallel", "parallel")),
    )(seed_arr, x2, pe2)

    return out2.reshape(B, S, D)


if __name__ == "__main__":
    d_model = 32
    seq_len = 8
    batch = 2
    dropout = 0.1

    key = jax.random.PRNGKey(0)
    x = jax.random.normal(key, (batch, seq_len, d_model), dtype=jnp.float32)

    pe = make_positional_encoding(d_model, seq_len)
    ref = x + pe[:, :seq_len, :]

    # Eval mode (dropout is identity): exact elementwise add check.
    out_eval = positional_encoding_forward(x, pe, dropout_rate=dropout, training=False)
    out_eval = jax.block_until_ready(out_eval)
    assert out_eval.shape == x.shape and out_eval.dtype == x.dtype
    assert jnp.allclose(out_eval, ref, atol=1e-5, rtol=1e-5)

    # Training mode: inverted-dropout semantics -- dropped elements are 0, kept elements
    # equal (x + pe) / (1 - p).
    out_train = positional_encoding_forward(
        x, pe, dropout_rate=dropout, training=True, seed=1234
    )
    out_train = jax.block_until_ready(out_train)
    assert out_train.shape == x.shape
    dropped = out_train == 0.0
    frac = float(jnp.mean(dropped.astype(jnp.float32)))
    assert 0.0 < frac < 0.5, f"implausible drop fraction {frac}"
    scale = 1.0 / (1.0 - dropout)
    assert jnp.allclose(
        jnp.where(dropped, 0.0, out_train),
        jnp.where(dropped, 0.0, ref * scale),
        atol=1e-5, rtol=1e-5,
    )

    print("KERNEL_OK")
</pallas_src>

<mosaic_0001>
module attributes {stable_mosaic.version = 11 : i64} {
  func.func @_pe_dropout_kernel(%arg0: i32, %arg1: i32, %arg2: memref<1xi32, #tpu.memory_space<smem>>, %arg3: memref<1x2x128xf32, #tpu.memory_space<vmem>>, %arg4: memref<1x2x128xf32, #tpu.memory_space<vmem>>, %arg5: memref<1x2x128xf32, #tpu.memory_space<vmem>>) attributes {dimension_semantics = [#tpu.dimension_semantics<parallel>, #tpu.dimension_semantics<parallel>], iteration_bounds = array<i64: 1, 2>, scalar_prefetch = 1 : i64, scratch_operands = 0 : i64, tpu.core_type = #tpu.core_type<tc>, window_params = [{transform_indices = @transform_0, window_bounds = array<i64: 1, 2, 128>}, {transform_indices = @transform_1, window_bounds = array<i64: 1, 2, 128>}, {transform_indices = @transform_2, window_bounds = array<i64: 1, 2, 128>}]} {
    %c0 = arith.constant 0 : index
    %c0_0 = arith.constant 0 : index
    %c0_1 = arith.constant 0 : index
    %0 = vector.load %arg3[%c0, %c0_0, %c0_1] : memref<1x2x128xf32, #tpu.memory_space<vmem>>, vector<1x2x128xf32>
    %c0_2 = arith.constant 0 : index
    %c0_3 = arith.constant 0 : index
    %c0_4 = arith.constant 0 : index
    %1 = vector.load %arg4[%c0_2, %c0_3, %c0_4] : memref<1x2x128xf32, #tpu.memory_space<vmem>>, vector<1x2x128xf32>
    %2 = arith.addf %0, %1 : vector<1x2x128xf32>
    %c0_5 = arith.constant 0 : index
    %c0_6 = arith.constant 0 : index
    %c0_7 = arith.constant 0 : index
    %3 = vector.load %arg5[%c0_5, %c0_6, %c0_7] : memref<1x2x128xf32, #tpu.memory_space<vmem>>, vector<1x2x128xf32>
    tpu.vector_store %arg5[%c0_5, %c0_6, %c0_7], %2 {strides = array<i32>} : memref<1x2x128xf32, #tpu.memory_space<vmem>>, vector<1x2x128xf32>,
    return
  }
  func.func @transform_0(%arg0: i32, %arg1: i32, %arg2: memref<1xi32, #tpu.memory_space<smem>>) -> (i32, i32, i32) {
    %c0_i32 = arith.constant 0 : i32
    %c0_i32_0 = arith.constant 0 : i32
    return %arg1, %arg0, %c0_i32 : i32, i32, i32
  }
  func.func @transform_1(%arg0: i32, %arg1: i32, %arg2: memref<1xi32, #tpu.memory_space<smem>>) -> (i32, i32, i32) {
    %c0_i32 = arith.constant 0 : i32
    %c0_i32_0 = arith.constant 0 : i32
    %c0_i32_1 = arith.constant 0 : i32
    return %c0_i32, %arg0, %c0_i32_0 : i32, i32, i32
  }
  func.func @transform_2(%arg0: i32, %arg1: i32, %arg2: memref<1xi32, #tpu.memory_space<smem>>) -> (i32, i32, i32) {
    %c0_i32 = arith.constant 0 : i32
    %c0_i32_0 = arith.constant 0 : i32
    return %arg1, %arg0, %c0_i32 : i32, i32, i32
  }
}

</mosaic_0001>

<bundles_post_ra>
// kernel: tpu_custom_call.1
= control target key start
LH: loop header
LB: loop body
LE: loop exit
PB: predicated region body
PF: predicated region fallthrough
CT: control target
= control target key end

     0   :  { %9 = vsyncpa [#allocation5], 0  ;;  %s696_s0 = inlined_call_operand.<no memory space> [shape: s32[1], index: 0, kind: input, shape index: {}]   ;;  %s697_s1 = inlined_call_operand.hbm [shape: f32[2,2,128], index: 1, kind: input, shape index: {}]   ;;  %s698_s2 = inlined_call_operand.vmem [shape: f32[1,2,128], index: 2, kind: input, shape index: {}]   ;;  %s699_s3 = inlined_call_operand.hbm [shape: f32[2,2,128], index: 3, kind: output, shape index: {}]  }
   0x1   :  { %11 = vsyncpa [#allocation5 + $0x1], 0 }
   0x2   :  { %12 = vsyncpa [#allocation6], 0 }
   0x3   :  { %14 = vsyncpa [#allocation6 + $0x1], 0  ;;  %s521_s12 = smov 0   ;;  %s523_s13 = smov 0  }
   0x4   :  { %s525_s14 = smov 0   ;;  %s527_s0 = smov 0  }
   0x5   :  { %s529_s15 = smov 0   ;;  %s531_s16 = smov 0  }
   0x6 LB: > { %s309_s17 = sadd.s32 4294967295, %s497_s16   ;;  %s310_s18 = sadd.s32 4294967294, %s497_s16   ;;  %s497_s16 = sphi %s531_s16, %s20_s16   ;;  %s493_s15 = sphi %s529_s15, %s715_s15   ;;  %s489_s0 = sphi %s527_s0, %s714_s0   ;;  %s485_s14 = sphi %s525_s14, %s713_s14   ;;  %s481_s13 = sphi %s523_s13, %s712_s13   ;;  %s477_s12 = sphi %s521_s12, %s711_s12  }
   0x7   : > { %s29_s19 = sadd.s32 1, %s493_s15  ;;  %s41_s20 = sadd.s32 1, %s485_s14 }
   0x8   : > { %p30_p0 = scmp.ge.s32.totalorder %s29_s19, 2  ;;  %p48_p1 = scmp.ne.s32.totalorder %s485_s14, %s481_s13 }
   0x9   : > { %p49_p2 = scmp.eq.s32.totalorder %s497_s16, 0  ;;  %p54_p3 = scmp.ne.s32.totalorder %s481_s13, %s477_s12 }
   0xa   : > { %s717_s19 = smov (%p30_p0, %s29_s19), 0  ;;  %p55_p5 = scmp.eq.s32.totalorder %s309_s17, 0 }
   0xb   : > { %p562_p4 = por %p49_p2, %p48_p1  ;;  %s36_s22 = ssub.s32 %s493_s15, %s717_s19 }
   0xc   : > { %p106_p6 = scmp.eq.s32.totalorder %s309_s17, 1  ;;  %p39_p7 = scmp.eq.s32.totalorder %s36_s22, 0 }
   0xd   : > { %p568_p8 = por %p55_p5, %p54_p3  ;;  %p112_p10 = scmp.eq.s32.totalorder %s310_s18, 1 }
   0xe   : > { %p572_p9 = por %p106_p6, %p48_p1  ;;  %p335_p13 = scmp.lt.s32.totalorder %s497_s16, 2 }
   0xf   : > { %s577_s25 = scalar_select %p39_p7, %s485_s14, %s41_s20  }
  0x10   : > { %s703_s24 = scalar_select %p572_p9, 1, 0 }
  0x11   : > { %p579_p11 = por %p112_p10, %p54_p3  ;;  %s139_s27 = sand.u32 1, %s485_s14  }
  0x12   : > { %s314_s28 = sshll.u32 %s139_s27, 1  ;;  %s315_s29 = sshll.u32 %s493_s15, 5 }
  0x13   : > { %s704_s26 = scalar_select %p579_p11, 1, 0 }
  0x14   : > { %s590_s5 = scalar_lea.hbm %s697_s1, %s315_s29  ;;  %s143_s6 = scalar_lea.vmem [#allocation4], %s314_s28 }
  0x15   : > { %s151_s7 = sshll.u32 %s143_s6, 4  ;;  %p596_p0 = pnand %p335_p13, %p562_p4  ;;  %s592_s7 = int_to_ptr.vmem [resolvable:$true] %s151_s7 }
  0x16   : > { %s140_s9 = scalar_lea.sflag [#allocation5], %s139_s27  ;;  %s385_s10 = scalar_lea.hbm %s590_s5, 32 }
  0x17   : > { %p386_p3 = scmp.ne.s32.totalorder %s590_s5, %s385_s10  ;;  %p387_p5 = pneg %p596_p0 }
  0x18   : > { %s390_s18 = scalar_lea.hbm %s697_s1, 64  ;;  %p391_p4 = scmp.lt.u32.totalorder %s590_s5, %s697_s1 }
  0x19   : > { %p388_p6 = pnand %p387_p5, %p386_p3  ;;  %p392_p10 = scmp.lt.u32.totalorder %s390_s18, %s385_s10 }
  0x1a   : > { %p394_p12 = scmp.lt.u32.totalorder %s385_s10, %s590_s5 }
  0x1b   : > { %p389_p7 = pneg %p388_p6  ;;  %p393_p13 = por %p392_p10, %p391_p4 }
  0x1d   : > { %p395_p1 = por %p394_p12, %p393_p13 }
  0x1f   : > { %p396_p2 = pnand %p395_p1, %p389_p7 }
  0x21   : > { %399 = shalt.err (!%p396_p2)
}
  0x22   : > { %s400_s22 = scalar_lea.vmem %s592_s7, 32  ;;  %s499_s27 = smov [#allocation4]  }
  0x23   : > { %p401_p3 = scmp.ne.s32.totalorder %s592_s7, %s400_s22  ;;  %s405_s28 = sshll.u32 %s499_s27, 4  ;;  %s406_s28 = int_to_ptr.vmem [resolvable:$false] %s405_s28 }
  0x24   : > { %s407_s29 = scalar_lea.vmem %s406_s28, 64  ;;  %p408_p9 = scmp.lt.s32.totalorder %s592_s7, %s406_s28 }
  0x25   : > { %p403_p6 = pnand %p401_p3, %p387_p5  ;;  %p409_p4 = scmp.lt.s32.totalorder %s407_s29, %s400_s22 }
  0x27   : > { %p404_p11 = pneg %p403_p6  ;;  %p410_p10 = por %p409_p4, %p408_p9 }
  0x29   : > { %p411_p12 = pnand %p410_p10, %p404_p11 }
  0x2b   : > { %414 = shalt.err (!%p411_p12)
}
  0x2c   : > { %330 = dma.hbm_to_vmem [thread:$0]  (!%p596_p0), %s590_s5, 32, %s592_s7, %s140_s9  }
  0x2d   : > { %p706_p1 = scmp.lt.s32.totalorder %s497_s16, 3  ;;  %p707_p2 = scmp.ge.s32.totalorder %s497_s16, 1 }
  0x2f   : > { %p157_p5 = pnand %p707_p2, %p706_p1 }
  0x30   : > { %s632_s30 = sand.u32 (!%p157_p5), 1, %s481_s13  }
  0x31   : > { %160 = sbr.rel (%p157_p5) target bundleno = 83 (0x53), region = 28  ;;  %s317_s4 = sshll.u32 (!%p157_p5), %s632_s30, 1 }
  0x32   : > { %s163_s6 = scalar_lea.sflag (!%p157_p5), [#allocation5], %s632_s30  ;;  %s166_s10 = scalar_lea.vmem (!%p157_p5), [#allocation4], %s317_s4 }
  0x38   : > { %468 = dma.done.wait (%p568_p8), %s163_s6, 32  }
  0x39   : > { %470 = vsyncadd (%p568_p8), %s163_s6, 4294967264  ;;  %s190_s5 = scalar_lea.vmem [#allocation7], %s317_s4  ;;  %s320_s8 = sshll.u32 %s489_s0, 5  ;;  %v195_v0 = vld [vmem:[%s166_s10] sm:$0x3] }
  0x3a   : > { %s214_s7 = sshll.u32 %s190_s5, 4  ;;  %v196_v1 = vld [vmem:[%s698_s2] sm:$0x3]  ;;  %s649_s23 = scalar_lea.hbm %s699_s3, %s320_s8  ;;  %s644_s7 = int_to_ptr.vmem [resolvable:$true] %s214_s7 }
  0x3b   : > { %v197_v2 = vadd.f32 %v196_v1, %v195_v0  ;;  %s200_s20 = scalar_lea.sflag [#allocation6], %s632_s30  ;;  %s415_s21 = scalar_lea.vmem %s644_s7, 32 }
  0x3c   : > { %p416_p8 = scmp.ne.s32.totalorder %s644_s7, %s415_s21  ;;  %p708_p9 = scmp.ne.s32.totalorder %s703_s24, 0 }
  0x3d   : > { %198 = vst [vmem:[%s190_s5] sm:$0x3] %v197_v2  ;;  %s500_s0 = smov [#allocation7]  }
  0x3e   : > { %p417_p11 = pnand %p416_p8, %p708_p9  ;;  %s419_s22 = sshll.u32 %s500_s0, 4  ;;  %s420_s22 = int_to_ptr.vmem [resolvable:$false] %s419_s22 }
  0x3f   : > { %s421_s27 = scalar_lea.vmem %s420_s22, 64  ;;  %p422_p7 = scmp.lt.s32.totalorder %s644_s7, %s420_s22 }
  0x40   : > { %p418_p0 = pneg %p417_p11  ;;  %p423_p13 = scmp.lt.s32.totalorder %s421_s27, %s415_s21 }
  0x42   : > { %p424_p3 = por %p423_p13, %p422_p7 }
  0x44   : > { %p425_p6 = pnand %p424_p3, %p418_p0 }
  0x46   : > { %428 = shalt.err (!%p425_p6)
}
  0x47   : > { %s429_s28 = scalar_lea.hbm %s649_s23, 32  ;;  %s433_s4 = scalar_lea.hbm %s699_s3, 64 }
  0x48   : > { %p430_p4 = scmp.ne.s32.totalorder %s649_s23, %s429_s28  ;;  %p434_p1 = scmp.lt.u32.totalorder %s649_s23, %s699_s3 }
  0x49   : > { %p435_p2 = scmp.lt.u32.totalorder %s433_s4, %s429_s28  ;;  %p437_p8 = scmp.lt.u32.totalorder %s429_s28, %s649_s23 }
  0x4a   : > { %p431_p10 = pnand %p430_p4, %p708_p9 }
  0x4b   : > { %p436_p5 = por %p435_p2, %p434_p1 }
  0x4c   : > { %p432_p12 = pneg %p431_p10 }
  0x4d   : > { %p438_p11 = por %p437_p8, %p436_p5 }
  0x4f   : > { %p439_p0 = pnand %p438_p11, %p432_p12 }
  0x51   : > { %442 = shalt.err (!%p439_p0)
}
  0x52   : > { %325 = dma.vmem_to_hbm [thread:$0]  (%p708_p9), %s644_s7, 32, %s649_s23, %s200_s20  }
  0x53 PF: > { %s226_s5 = sand.u32 1, %s477_s12   ;;  %p709_p7 = scmp.ne.s32.totalorder %s704_s26, 0 }
  0x54   : > { %p710_p13 = scmp.ge.s32.totalorder %s497_s16, 2  ;;  %s227_s8 = scalar_lea.sflag [#allocation6], %s226_s5 }
  0x56   : > { %p332_p3 = pnand %p710_p13, %p709_p7 }
  0x58   : > { %472 = dma.done.wait (!%p332_p3), %s227_s8, 32  }
  0x59   : > { %474 = vsyncadd (!%p332_p3), %s227_s8, 4294967264  ;;  %s20_s16 = sadd.s32 1, %s497_s16   ;;  %s711_s12 = smov %s481_s13 }
  0x5a   : > { %p17_p6 = scmp.ge.s32.totalorder %s20_s16, 4   ;;  %s712_s13 = smov %s485_s14 }
  0x5b   : > { %s713_s14 = smov %s577_s25  ;;  %s714_s0 = smov %s493_s15 }
  0x5c   : > { %s715_s15 = smov %s717_s19  ;;  %19 = sbr.rel (!%p17_p6) target bundleno = 6 (0x6), region = 76 }
  0x63   :  { %232 = vsyncpa [#allocation5], 1 }
  0x64   :  { %234 = vsyncpa [#allocation5 + $0x1], 1 }
  0x65   :  { %235 = vsyncpa [#allocation6], 1 }
  0x66   :  { %237 = vsyncpa [#allocation6 + $0x1], 1 }

</bundles_post_ra>
